<compile_context>
chip_gen: v5e
topology: v5e:2x2
jax: 0.10.0
libtpu: 0.0.40
codegen_flags: <defaults>
</compile_context>

<pallas_src>
import math

import jax
import jax.numpy as jnp
from jax.experimental import pallas as pl
from jax.experimental.pallas import tpu as pltpu


def _round_up(n, m):
    return ((n + m - 1) // m) * m


def _deep_ae_kernel(x_ref,
                    w0_ref, b0_ref, w1_ref, b1_ref, w2_ref, b2_ref,
                    w3_ref, b3_ref, w4_ref, b4_ref, w5_ref, b5_ref,
                    o_ref):
    """One batch tile through all six Linear+ReLU layers.

    x_ref:  (TILE_B, N_FC0)   float32 (downcast to bf16 in-kernel)
    w*_ref: (in_pad, out_pad) bf16, VMEM-resident (constant index_map)
    b*_ref: (1, out_pad)      float32
    o_ref:  (TILE_B, N_FC0)   bf16 (or f32 if requested)
    """
    layers = ((w0_ref, b0_ref), (w1_ref, b1_ref), (w2_ref, b2_ref),
              (w3_ref, b3_ref), (w4_ref, b4_ref), (w5_ref, b5_ref))
    n_layers = len(layers)

    # In-kernel downcast: activations arrive as f32, MXU feeds are bf16.
    h = x_ref[...].astype(w0_ref.dtype)
    for li, (w_ref, b_ref) in enumerate(layers):
        acc = jnp.dot(h, w_ref[...], preferred_element_type=jnp.float32)
        acc = jnp.maximum(acc + b_ref[...], 0.0)        # f32 bias + ReLU (VPU)
        if li < n_layers - 1:
            h = acc.astype(w_ref.dtype)                 # bf16 for next MXU pass
        else:
            o_ref[...] = acc.astype(o_ref.dtype)


def init_deep_ae_params(key, time_steps, n_features):
    """Xavier-uniform weights stored as (in, out) plus zero biases (out,),
    mirroring deepAE.reset_parameters()."""
    n_fc0 = time_steps * n_features
    n_fc1 = n_fc0 // 4
    n_fc2 = n_fc1 // 4
    n_fc3 = n_fc2 // 4

    dims = [
        (n_fc0, n_fc1), (n_fc1, n_fc2), (n_fc2, n_fc3),   # encoder
        (n_fc3, n_fc2), (n_fc2, n_fc1), (n_fc1, n_fc0),   # decoder
    ]

    params = []
    for fan_in, fan_out in dims:
        key, wkey = jax.random.split(key)
        bound = math.sqrt(6.0 / (fan_in + fan_out))
        w = jax.random.uniform(wkey, (fan_in, fan_out),
                               minval=-bound, maxval=bound, dtype=jnp.float32)
        b = jnp.zeros((fan_out,), dtype=jnp.float32)
        params.append((w, b))
    return params


def prepare_params(params, time_steps, n_features,
                   compute_dtype=jnp.bfloat16, lane=128):
    """Fold the NCW<->NWC permutes into W0 / (W5, b5), zero-pad the narrow
    hidden dims to 128 lanes, cast weights to the MXU compute dtype."""
    T, F = time_steps, n_features
    n_fc0 = T * F

    # Kernel flat order is f*T + t (x.reshape(B, F*T)); torch's flatten order
    # is t*F + f.  perm[new] = old.
    idx = jnp.arange(n_fc0)
    perm = (idx % T) * F + (idx // T)

    ws = [jnp.asarray(w, jnp.float32) for w, _ in params]
    bs = [jnp.asarray(b, jnp.float32).reshape(1, -1) for _, b in params]

    ws[0] = ws[0][perm, :]        # fold input permute into first layer
    ws[-1] = ws[-1][:, perm]      # fold output permute into last layer
    bs[-1] = bs[-1][:, perm]

    flat = []
    n_layers = len(ws)
    for li in range(n_layers):
        w, b = ws[li], bs[li]
        in_dim, out_dim = w.shape
        in_pad = 0 if li == 0 else _round_up(in_dim, lane) - in_dim
        out_pad = 0 if li == n_layers - 1 else _round_up(out_dim, lane) - out_dim
        if in_pad or out_pad:
            w = jnp.pad(w, ((0, in_pad), (0, out_pad)))
            b = jnp.pad(b, ((0, 0), (0, out_pad)))
        flat.append(w.astype(compute_dtype))   # weights: bf16 MXU feed
        flat.append(b)                         # biases: keep f32 for VPU add
    return flat


def deep_ae_forward(x, flat_params, time_steps, n_features, *,
                    tile_b=512, out_dtype=jnp.bfloat16):
    """x: (B, n_features, time_steps) float32. Returns (B, n_features,
    time_steps) in out_dtype (default bf16; pass jnp.float32 for module
    dtype parity at ~1.5x output HBM traffic)."""
    B, F, T = x.shape
    assert F == n_features and T == time_steps
    n_fc0 = T * F

    # Permutes are folded into the weights: zero-cost reshape only.  No cast,
    # no transpose, no pad -> no extra HBM passes before the kernel.
    x_flat = x.reshape(B, n_fc0)

    # Batch tiling. 16-row alignment covers both the f32 input (8-sublane)
    # and bf16 output (16-sublane) tiles.
    row_align = 16
    tile_b = _round_up(min(max(tile_b, row_align), _round_up(B, row_align)),
                       row_align)
    if pl.cdiv(B, tile_b) == 1 and B > row_align:
        # Keep >= 2 grid steps so v7x's second TensorCore gets work.
        tile_b = _round_up(-(-B // 2), row_align)
    grid = (pl.cdiv(B, tile_b),)   # partial last block allowed (rows independent)

    x_spec = pl.BlockSpec((tile_b, n_fc0), lambda i: (i, 0))
    out_spec = pl.BlockSpec((tile_b, n_fc0), lambda i: (i, 0))
    # Weights/biases: full-array blocks with constant index_map -> fetched
    # once, VMEM-resident across every batch tile.
    param_specs = [pl.BlockSpec(p.shape, lambda i: (0, 0)) for p in flat_params]

    out_flat = pl.pallas_call(
        _deep_ae_kernel,
        out_shape=jax.ShapeDtypeStruct((B, n_fc0), out_dtype),
        grid=grid,
        in_specs=[x_spec] + param_specs,
        out_specs=out_spec,
        # "parallel" batch axis: megacore-shardable; harmless on 1-TC chips.
        # TODO(synk): if an xprof trace on v7x shows exposed input DMA, bump
        # x_spec/out_spec to pipeline_mode=pl.Buffered(3).
        compiler_params=pltpu.CompilerParams(
            dimension_semantics=("parallel",)),
    )(x_flat, *flat_params)

    # Output permute already folded into W5/b5: plain reshape to (B, F, T).
    return out_flat.reshape(B, n_features, time_steps)


# TODO(synk): trainAllLayers / save_params / load_params / get_model
# (optimizer loop, file I/O) have no Pallas equivalent; only forward() is
# implemented here.


if __name__ == "__main__":
    # Small shapes consistent with the module (N_FC0 divisible by 64 so the
    # hidden dims are integers): N_FC0=512, hidden dims 128/32/8.
    TIME_STEPS = 128
    N_FEATURES = 4

    key = jax.random.PRNGKey(0)
    key, pkey = jax.random.split(key)
    params = init_deep_ae_params(pkey, TIME_STEPS, N_FEATURES)
    flat_params = prepare_params(params, TIME_STEPS, N_FEATURES,
                                 compute_dtype=jnp.bfloat16)

    # Reference 1: identical math in plain JAX (bf16 matmul inputs, f32 acc,
    # torch's original permute/flatten order).
    def ref_bf16(x):
        B = x.shape[0]
        h = jnp.transpose(x, (0, 2, 1)).reshape(B, -1).astype(jnp.bfloat16)
        for li, (w, b) in enumerate(params):
            acc = jnp.dot(h, w.astype(jnp.bfloat16),
                          preferred_element_type=jnp.float32)
            acc = jnp.maximum(acc + b.reshape(1, -1), 0.0)
            h = acc.astype(jnp.bfloat16) if li < len(params) - 1 else acc
        return jnp.transpose(h.reshape(B, TIME_STEPS, N_FEATURES), (0, 2, 1))

    # Reference 2: the exact float32 PyTorch forward math.
    def ref_f32(x):
        B = x.shape[0]
        h = jnp.transpose(x, (0, 2, 1)).reshape(B, -1)
        for w, b in params:
            h = jnp.maximum(h @ w + b.reshape(1, -1), 0.0)
        return jnp.transpose(h.reshape(B, TIME_STEPS, N_FEATURES), (0, 2, 1))

    # batch=2  : single (partial) block.
    # batch=40 : two grid tiles with a partial last block (exercises the
    #            no-pad / masked-writeback path and multi-tile pipelining).
    for batch in (2, 40):
        key, xkey = jax.random.split(key)
        x = jax.random.normal(xkey, (batch, N_FEATURES, TIME_STEPS),
                              dtype=jnp.float32)

        out = deep_ae_forward(x, flat_params, TIME_STEPS, N_FEATURES)
        out = jax.block_until_ready(out)
        assert out.shape == (batch, N_FEATURES, TIME_STEPS)

        out32 = out.astype(jnp.float32)
        r16 = ref_bf16(x)
        r32 = ref_f32(x)
        assert jnp.allclose(out32, r16, atol=8e-3, rtol=8e-3), \
            float(jnp.max(jnp.abs(out32 - r16)))
        assert jnp.allclose(out32, r32, atol=4e-2, rtol=4e-2), \
            float(jnp.max(jnp.abs(out32 - r32)))

    print("KERNEL_OK")
</pallas_src>

<mosaic_0001>
module attributes {stable_mosaic.version = 11 : i64} {
  func.func @_deep_ae_kernel(%arg0: i32, %arg1: memref<16x512xf32, #tpu.memory_space<vmem>>, %arg2: memref<512x128xbf16, #tpu.memory_space<vmem>>, %arg3: memref<1x128xf32, #tpu.memory_space<vmem>>, %arg4: memref<128x128xbf16, #tpu.memory_space<vmem>>, %arg5: memref<1x128xf32, #tpu.memory_space<vmem>>, %arg6: memref<128x128xbf16, #tpu.memory_space<vmem>>, %arg7: memref<1x128xf32, #tpu.memory_space<vmem>>, %arg8: memref<128x128xbf16, #tpu.memory_space<vmem>>, %arg9: memref<1x128xf32, #tpu.memory_space<vmem>>, %arg10: memref<128x128xbf16, #tpu.memory_space<vmem>>, %arg11: memref<1x128xf32, #tpu.memory_space<vmem>>, %arg12: memref<128x512xbf16, #tpu.memory_space<vmem>>, %arg13: memref<1x512xf32, #tpu.memory_space<vmem>>, %arg14: memref<16x512xbf16, #tpu.memory_space<vmem>>) attributes {dimension_semantics = [#tpu.dimension_semantics<parallel>], iteration_bounds = array<i64: 1>, scalar_prefetch = 0 : i64, scratch_operands = 0 : i64, tpu.core_type = #tpu.core_type<tc>, window_params = [{transform_indices = @transform_0, window_bounds = array<i64: 16, 512>}, {pipeline_mode = #tpu.pipeline_mode<synchronous>, transform_indices = @transform_1, window_bounds = array<i64: 512, 128>}, {pipeline_mode = #tpu.pipeline_mode<synchronous>, transform_indices = @transform_2, window_bounds = array<i64: 1, 128>}, {pipeline_mode = #tpu.pipeline_mode<synchronous>, transform_indices = @transform_3, window_bounds = array<i64: 128, 128>}, {pipeline_mode = #tpu.pipeline_mode<synchronous>, transform_indices = @transform_4, window_bounds = array<i64: 1, 128>}, {pipeline_mode = #tpu.pipeline_mode<synchronous>, transform_indices = @transform_5, window_bounds = array<i64: 128, 128>}, {pipeline_mode = #tpu.pipeline_mode<synchronous>, transform_indices = @transform_6, window_bounds = array<i64: 1, 128>}, {pipeline_mode = #tpu.pipeline_mode<synchronous>, transform_indices = @transform_7, window_bounds = array<i64: 128, 128>}, {pipeline_mode = #tpu.pipeline_mode<synchronous>, transform_indices = @transform_8, window_bounds = array<i64: 1, 128>}, {pipeline_mode = #tpu.pipeline_mode<synchronous>, transform_indices = @transform_9, window_bounds = array<i64: 128, 128>}, {pipeline_mode = #tpu.pipeline_mode<synchronous>, transform_indices = @transform_10, window_bounds = array<i64: 1, 128>}, {pipeline_mode = #tpu.pipeline_mode<synchronous>, transform_indices = @transform_11, window_bounds = array<i64: 128, 512>}, {pipeline_mode = #tpu.pipeline_mode<synchronous>, transform_indices = @transform_12, window_bounds = array<i64: 1, 512>}, {transform_indices = @transform_13, window_bounds = array<i64: 16, 512>}]} {
    %c0 = arith.constant 0 : index
    %c0_0 = arith.constant 0 : index
    %0 = vector.load %arg1[%c0, %c0_0] : memref<16x512xf32, #tpu.memory_space<vmem>>, vector<16x512xf32>
    %1 = arith.truncf %0 : vector<16x512xf32> to vector<16x512xbf16>
    %c0_1 = arith.constant 0 : index
    %c0_2 = arith.constant 0 : index
    %2 = vector.load %arg2[%c0_1, %c0_2] : memref<512x128xbf16, #tpu.memory_space<vmem>>, vector<512x128xbf16>
    %cst = arith.constant dense<0.000000e+00> : vector<16x128xf32>
    %3 = tpu.matmul %1, %2, %cst {dimension_numbers = #tpu.dot_dimension_numbers<[1], [0], [0], [1], [0, 0, 1, 1], [], []>} : vector<16x512xbf16>, vector<512x128xbf16>, vector<16x128xf32> -> vector<16x128xf32>
    %c0_3 = arith.constant 0 : index
    %c0_4 = arith.constant 0 : index
    %4 = vector.load %arg3[%c0_3, %c0_4] : memref<1x128xf32, #tpu.memory_space<vmem>>, vector<1x128xf32>
    %5 = vector.broadcast %4 : vector<1x128xf32> to vector<16x128xf32>
    %6 = arith.addf %3, %5 : vector<16x128xf32>
    %cst_5 = arith.constant 0.000000e+00 : f32
    %7 = vector.broadcast %cst_5 : f32 to vector<16x128xf32>
    %8 = arith.maximumf %6, %7 : vector<16x128xf32>
    %9 = arith.truncf %8 : vector<16x128xf32> to vector<16x128xbf16>
    %c0_6 = arith.constant 0 : index
    %c0_7 = arith.constant 0 : index
    %10 = vector.load %arg4[%c0_6, %c0_7] : memref<128x128xbf16, #tpu.memory_space<vmem>>, vector<128x128xbf16>
    %cst_8 = arith.constant dense<0.000000e+00> : vector<16x128xf32>
    %11 = tpu.matmul %9, %10, %cst_8 {dimension_numbers = #tpu.dot_dimension_numbers<[1], [0], [0], [1], [0, 0, 1, 1], [], []>} : vector<16x128xbf16>, vector<128x128xbf16>, vector<16x128xf32> -> vector<16x128xf32>
    %c0_9 = arith.constant 0 : index
    %c0_10 = arith.constant 0 : index
    %12 = vector.load %arg5[%c0_9, %c0_10] : memref<1x128xf32, #tpu.memory_space<vmem>>, vector<1x128xf32>
    %13 = vector.broadcast %12 : vector<1x128xf32> to vector<16x128xf32>
    %14 = arith.addf %11, %13 : vector<16x128xf32>
    %cst_11 = arith.constant 0.000000e+00 : f32
    %15 = vector.broadcast %cst_11 : f32 to vector<16x128xf32>
    %16 = arith.maximumf %14, %15 : vector<16x128xf32>
    %17 = arith.truncf %16 : vector<16x128xf32> to vector<16x128xbf16>
    %c0_12 = arith.constant 0 : index
    %c0_13 = arith.constant 0 : index
    %18 = vector.load %arg6[%c0_12, %c0_13] : memref<128x128xbf16, #tpu.memory_space<vmem>>, vector<128x128xbf16>
    %cst_14 = arith.constant dense<0.000000e+00> : vector<16x128xf32>
    %19 = tpu.matmul %17, %18, %cst_14 {dimension_numbers = #tpu.dot_dimension_numbers<[1], [0], [0], [1], [0, 0, 1, 1], [], []>} : vector<16x128xbf16>, vector<128x128xbf16>, vector<16x128xf32> -> vector<16x128xf32>
    %c0_15 = arith.constant 0 : index
    %c0_16 = arith.constant 0 : index
    %20 = vector.load %arg7[%c0_15, %c0_16] : memref<1x128xf32, #tpu.memory_space<vmem>>, vector<1x128xf32>
    %21 = vector.broadcast %20 : vector<1x128xf32> to vector<16x128xf32>
    %22 = arith.addf %19, %21 : vector<16x128xf32>
    %cst_17 = arith.constant 0.000000e+00 : f32
    %23 = vector.broadcast %cst_17 : f32 to vector<16x128xf32>
    %24 = arith.maximumf %22, %23 : vector<16x128xf32>
    %25 = arith.truncf %24 : vector<16x128xf32> to vector<16x128xbf16>
    %c0_18 = arith.constant 0 : index
    %c0_19 = arith.constant 0 : index
    %26 = vector.load %arg8[%c0_18, %c0_19] : memref<128x128xbf16, #tpu.memory_space<vmem>>, vector<128x128xbf16>
    %cst_20 = arith.constant dense<0.000000e+00> : vector<16x128xf32>
    %27 = tpu.matmul %25, %26, %cst_20 {dimension_numbers = #tpu.dot_dimension_numbers<[1], [0], [0], [1], [0, 0, 1, 1], [], []>} : vector<16x128xbf16>, vector<128x128xbf16>, vector<16x128xf32> -> vector<16x128xf32>
    %c0_21 = arith.constant 0 : index
    %c0_22 = arith.constant 0 : index
    %28 = vector.load %arg9[%c0_21, %c0_22] : memref<1x128xf32, #tpu.memory_space<vmem>>, vector<1x128xf32>
    %29 = vector.broadcast %28 : vector<1x128xf32> to vector<16x128xf32>
    %30 = arith.addf %27, %29 : vector<16x128xf32>
    %cst_23 = arith.constant 0.000000e+00 : f32
    %31 = vector.broadcast %cst_23 : f32 to vector<16x128xf32>
    %32 = arith.maximumf %30, %31 : vector<16x128xf32>
    %33 = arith.truncf %32 : vector<16x128xf32> to vector<16x128xbf16>
    %c0_24 = arith.constant 0 : index
    %c0_25 = arith.constant 0 : index
    %34 = vector.load %arg10[%c0_24, %c0_25] : memref<128x128xbf16, #tpu.memory_space<vmem>>, vector<128x128xbf16>
    %cst_26 = arith.constant dense<0.000000e+00> : vector<16x128xf32>
    %35 = tpu.matmul %33, %34, %cst_26 {dimension_numbers = #tpu.dot_dimension_numbers<[1], [0], [0], [1], [0, 0, 1, 1], [], []>} : vector<16x128xbf16>, vector<128x128xbf16>, vector<16x128xf32> -> vector<16x128xf32>
    %c0_27 = arith.constant 0 : index
    %c0_28 = arith.constant 0 : index
    %36 = vector.load %arg11[%c0_27, %c0_28] : memref<1x128xf32, #tpu.memory_space<vmem>>, vector<1x128xf32>
    %37 = vector.broadcast %36 : vector<1x128xf32> to vector<16x128xf32>
    %38 = arith.addf %35, %37 : vector<16x128xf32>
    %cst_29 = arith.constant 0.000000e+00 : f32
    %39 = vector.broadcast %cst_29 : f32 to vector<16x128xf32>
    %40 = arith.maximumf %38, %39 : vector<16x128xf32>
    %41 = arith.truncf %40 : vector<16x128xf32> to vector<16x128xbf16>
    %c0_30 = arith.constant 0 : index
    %c0_31 = arith.constant 0 : index
    %42 = vector.load %arg12[%c0_30, %c0_31] : memref<128x512xbf16, #tpu.memory_space<vmem>>, vector<128x512xbf16>
    %cst_32 = arith.constant dense<0.000000e+00> : vector<16x512xf32>
    %43 = tpu.matmul %41, %42, %cst_32 {dimension_numbers = #tpu.dot_dimension_numbers<[1], [0], [0], [1], [0, 0, 1, 1], [], []>} : vector<16x128xbf16>, vector<128x512xbf16>, vector<16x512xf32> -> vector<16x512xf32>
    %c0_33 = arith.constant 0 : index
    %c0_34 = arith.constant 0 : index
    %44 = vector.load %arg13[%c0_33, %c0_34] : memref<1x512xf32, #tpu.memory_space<vmem>>, vector<1x512xf32>
    %45 = vector.broadcast %44 : vector<1x512xf32> to vector<16x512xf32>
    %46 = arith.addf %43, %45 : vector<16x512xf32>
    %cst_35 = arith.constant 0.000000e+00 : f32
    %47 = vector.broadcast %cst_35 : f32 to vector<16x512xf32>
    %48 = arith.maximumf %46, %47 : vector<16x512xf32>
    %49 = arith.truncf %48 : vector<16x512xf32> to vector<16x512xbf16>
    %c0_36 = arith.constant 0 : index
    %c0_37 = arith.constant 0 : index
    %50 = vector.load %arg14[%c0_36, %c0_37] : memref<16x512xbf16, #tpu.memory_space<vmem>>, vector<16x512xbf16>
    tpu.vector_store %arg14[%c0_36, %c0_37], %49 {strides = array<i32>} : memref<16x512xbf16, #tpu.memory_space<vmem>>, vector<16x512xbf16>,
    return
  }
  func.func @transform_0(%arg0: i32) -> (i32, i32) {
    %c0_i32 = arith.constant 0 : i32
    %c0_i32_0 = arith.constant 0 : i32
    return %arg0, %c0_i32 : i32, i32
  }
  func.func @transform_1(%arg0: i32) -> (i32, i32) {
    %c0_i32 = arith.constant 0 : i32
    %c0_i32_0 = arith.constant 0 : i32
    %c0_i32_1 = arith.constant 0 : i32
    return %c0_i32, %c0_i32_0 : i32, i32
  }
  func.func @transform_2(%arg0: i32) -> (i32, i32) {
    %c0_i32 = arith.constant 0 : i32
    %c0_i32_0 = arith.constant 0 : i32
    %c0_i32_1 = arith.constant 0 : i32
    return %c0_i32, %c0_i32_0 : i32, i32
  }
  func.func @transform_3(%arg0: i32) -> (i32, i32) {
    %c0_i32 = arith.constant 0 : i32
    %c0_i32_0 = arith.constant 0 : i32
    %c0_i32_1 = arith.constant 0 : i32
    return %c0_i32, %c0_i32_0 : i32, i32
  }
  func.func @transform_4(%arg0: i32) -> (i32, i32) {
    %c0_i32 = arith.constant 0 : i32
    %c0_i32_0 = arith.constant 0 : i32
    %c0_i32_1 = arith.constant 0 : i32
    return %c0_i32, %c0_i32_0 : i32, i32
  }
  func.func @transform_5(%arg0: i32) -> (i32, i32) {
    %c0_i32 = arith.constant 0 : i32
    %c0_i32_0 = arith.constant 0 : i32
    %c0_i32_1 = arith.constant 0 : i32
    return %c0_i32, %c0_i32_0 : i32, i32
  }
  func.func @transform_6(%arg0: i32) -> (i32, i32) {
    %c0_i32 = arith.constant 0 : i32
    %c0_i32_0 = arith.constant 0 : i32
    %c0_i32_1 = arith.constant 0 : i32
    return %c0_i32, %c0_i32_0 : i32, i32
  }
  func.func @transform_7(%arg0: i32) -> (i32, i32) {
    %c0_i32 = arith.constant 0 : i32
    %c0_i32_0 = arith.constant 0 : i32
    %c0_i32_1 = arith.constant 0 : i32
    return %c0_i32, %c0_i32_0 : i32, i32
  }
  func.func @transform_8(%arg0: i32) -> (i32, i32) {
    %c0_i32 = arith.constant 0 : i32
    %c0_i32_0 = arith.constant 0 : i32
    %c0_i32_1 = arith.constant 0 : i32
    return %c0_i32, %c0_i32_0 : i32, i32
  }
  func.func @transform_9(%arg0: i32) -> (i32, i32) {
    %c0_i32 = arith.constant 0 : i32
    %c0_i32_0 = arith.constant 0 : i32
    %c0_i32_1 = arith.constant 0 : i32
    return %c0_i32, %c0_i32_0 : i32, i32
  }
  func.func @transform_10(%arg0: i32) -> (i32, i32) {
    %c0_i32 = arith.constant 0 : i32
    %c0_i32_0 = arith.constant 0 : i32
    %c0_i32_1 = arith.constant 0 : i32
    return %c0_i32, %c0_i32_0 : i32, i32
  }
  func.func @transform_11(%arg0: i32) -> (i32, i32) {
    %c0_i32 = arith.constant 0 : i32
    %c0_i32_0 = arith.constant 0 : i32
    %c0_i32_1 = arith.constant 0 : i32
    return %c0_i32, %c0_i32_0 : i32, i32
  }
  func.func @transform_12(%arg0: i32) -> (i32, i32) {
    %c0_i32 = arith.constant 0 : i32
    %c0_i32_0 = arith.constant 0 : i32
    %c0_i32_1 = arith.constant 0 : i32
    return %c0_i32, %c0_i32_0 : i32, i32
  }
  func.func @transform_13(%arg0: i32) -> (i32, i32) {
    %c0_i32 = arith.constant 0 : i32
    %c0_i32_0 = arith.constant 0 : i32
    return %arg0, %c0_i32 : i32, i32
  }
}

</mosaic_0001>

<bundles_post_ra>
// kernel: tpu_custom_call.1
= control target key start
LH: loop header
LB: loop body
LE: loop exit
PB: predicated region body
PF: predicated region fallthrough
CT: control target
= control target key end

     0   :  { %18 = vsyncpa [#allocation3], 0  ;;  %s2148_s0 = inlined_call_operand.hbm [shape: f32[2,512], index: 0, kind: input, shape index: {}]   ;;  %s2149_s1 = inlined_call_operand.hbm [shape: bf16[512,128], index: 1, kind: input, shape index: {}]   ;;  %s2150_s2 = inlined_call_operand.vmem [shape: f32[1,128], index: 2, kind: input, shape index: {}]   ;;  %s2151_s3 = inlined_call_operand.hbm [shape: bf16[128,128], index: 3, kind: input, shape index: {}]   ;;  %s2152_s4 = inlined_call_operand.vmem [shape: f32[1,128], index: 4, kind: input, shape index: {}]   ;;  %s2153_s5 = inlined_call_operand.hbm [shape: bf16[128,128], index: 5, kind: input, shape index: {}]   ;;  %s2154_s6 = inlined_call_operand.vmem [shape: f32[1,128], index: 6, kind: input, shape index: {}]   ;;  %s2155_s7 = inlined_call_operand.hbm [shape: bf16[128,128], index: 7, kind: input, shape index: {}]   ;;  %s2156_s8 = inlined_call_operand.hbm [shape: f32[1,128], index: 8, kind: input, shape index: {}]   ;;  %s2157_s9 = inlined_call_operand.hbm [shape: bf16[128,128], index: 9, kind: input, shape index: {}]   ;;  %s2158_s10 = inlined_call_operand.vmem [shape: f32[1,128], index: 10, kind: input, shape index: {}]   ;;  %s2159_s11 = inlined_call_operand.hbm [shape: bf16[128,512], index: 11, kind: input, shape index: {}]   ;;  %s2160_s12 = inlined_call_operand.vmem [shape: f32[1,512], index: 12, kind: input, shape index: {}]   ;;  %s2161_s13 = inlined_call_operand.hbm [shape: bf16[2,512], index: 13, kind: output, shape index: {}]  }
   0x1   :  { %19 = vsyncpa [#allocation6], 0 }
   0x2   :  { %20 = vsyncpa [#allocation9], 0 }
   0x3   :  { %21 = vsyncpa [#allocation12], 0 }
   0x4   :  { %22 = vsyncpa [#allocation15], 0 }
   0x5   :  { %23 = vsyncpa [#allocation4], 0  ;;  %s41_s27 = sshll.u32 %s2149_s1, 4  ;;  %s42_s27 = int_to_ptr.hbm [resolvable:$true] %s41_s27 }
   0x6   :  { %27 = vsyncadd [#allocation3], 896  ;;  %s1979_s28 = smov [#allocation5]   ;;  %s71_s15 = sshll.u32 %s2153_s5, 4  ;;  %s72_s15 = int_to_ptr.hbm [resolvable:$true] %s71_s15 }
   0x7   :  { %s43_s29 = sshll.u32 %s1979_s28, 4  ;;  %s1980_s16 = smov 64   ;;  %s44_s29 = int_to_ptr.vmem [resolvable:$true] %s43_s29 }
   0x8   :  { %s1981_s17 = smov 4   ;;  %s1982_s18 = smov [#allocation8]  }
   0x9   :  { %49 = dma.hbm_to_vmem [thread:$0]  %s42_s27, 4096, %s44_s29, [#allocation6], %s1980_s16, %s1980_s16, %s1981_s17  }
   0xa   :  { %s73_s19 = sshll.u32 %s1982_s18, 4  ;;  %s100_s21 = sshll.u32 %s2156_s8, 4  ;;  %s74_s19 = int_to_ptr.vmem [resolvable:$true] %s73_s19  ;;  %s101_s21 = int_to_ptr.hbm [resolvable:$true] %s100_s21 }
   0xb   :  { %79 = dma.hbm_to_vmem [thread:$0]  %s72_s15, 1024, %s74_s19, [#allocation9], %s1980_s16, %s1980_s16, %s1981_s17  }
   0xc   :  { %s28_s23 = sshll.u32 %s2148_s0, 4  ;;  %s1983_s24 = smov [#allocation11]   ;;  %s29_s23 = int_to_ptr.hbm [resolvable:$true] %s28_s23 }
   0xd   :  { %s102_s25 = sshll.u32 %s1983_s24, 4  ;;  %s1984_s26 = smov [#allocation2]   ;;  %s103_s25 = int_to_ptr.vmem [resolvable:$true] %s102_s25 }
   0xe   :  { %105 = dma.hbm_to_vmem [thread:$0]  %s101_s21, 16, %s103_s25, [#allocation12]  }
   0xf   :  { %s30_s27 = sshll.u32 %s1984_s26, 4  ;;  %s1985_s28 = smov 128   ;;  %s31_s27 = int_to_ptr.vmem [resolvable:$true] %s30_s27 }
  0x10   :  { %s1986_s8 = smov 8   ;;  %s56_s14 = sshll.u32 %s2151_s3, 4  ;;  %s57_s14 = int_to_ptr.hbm [resolvable:$true] %s56_s14 }
  0x11   :  { %36 = dma.hbm_to_vmem [thread:$0]  %s29_s23, 128, %s31_s27, [#allocation3], %s1985_s28, %s1985_s28, %s1986_s8  }
  0x12   :  { %s1987_s15 = smov [#allocation7]   ;;  %s86_s20 = sshll.u32 %s2155_s7, 4  ;;  %s87_s20 = int_to_ptr.hbm [resolvable:$true] %s86_s20 }
  0x13   :  { %s58_s18 = sshll.u32 %s1987_s15, 4  ;;  %s1988_s1 = smov [#allocation10]   ;;  %s59_s18 = int_to_ptr.vmem [resolvable:$true] %s58_s18 }
  0x14   :  { %64 = dma.hbm_to_vmem [thread:$0]  %s57_s14, 1024, %s59_s18, [#allocation6], %s1980_s16, %s1980_s16, %s1981_s17  }
  0x15   :  { %s88_s21 = sshll.u32 %s1988_s1, 4  ;;  %s110_s23 = sshll.u32 %s2157_s9, 4  ;;  %s89_s21 = int_to_ptr.vmem [resolvable:$true] %s88_s21  ;;  %s111_s23 = int_to_ptr.hbm [resolvable:$true] %s110_s23 }
  0x16   :  { %94 = dma.hbm_to_vmem [thread:$0]  %s87_s20, 1024, %s89_s21, [#allocation9], %s1980_s16, %s1980_s16, %s1981_s17  }
  0x17   :  { %s125_s7 = sshll.u32 %s2159_s11, 4  ;;  %s1989_s25 = smov [#allocation13]   ;;  %s126_s7 = int_to_ptr.hbm [resolvable:$true] %s125_s7 }
  0x18   :  { %s112_s26 = sshll.u32 %s1989_s25, 4  ;;  %s1990_s27 = smov [#allocation14]   ;;  %s113_s26 = int_to_ptr.vmem [resolvable:$true] %s112_s26 }
  0x19   :  { %118 = dma.hbm_to_vmem [thread:$0]  %s111_s23, 1024, %s113_s26, [#allocation12], %s1980_s16, %s1980_s16, %s1981_s17  }
  0x1a   :  { %s127_s9 = sshll.u32 %s1990_s27, 4  ;;  %s1991_s28 = smov 256   ;;  %s128_s9 = int_to_ptr.vmem [resolvable:$true] %s127_s9 }
  0x1b   :  { %s1992_s8 = smov 16  }
  0x1c   :  { %133 = dma.hbm_to_vmem [thread:$0]  %s126_s7, 4096, %s128_s9, [#allocation15], %s1991_s28, %s1991_s28, %s1992_s8  }
  0x1d   :  { %1967 = dma.done.wait [#allocation3], 1024  }
  0x1e   :  { %1968 = vsyncadd [#allocation3], 4294966272 }
  0x1f   :  { %1969 = dma.done.wait [#allocation6], 5120  }
  0x20   :  { %1970 = vsyncadd [#allocation6], 4294962176 }
  0x21   :  { %1971 = dma.done.wait [#allocation9], 2048  }
  0x22   :  { %1972 = vsyncadd [#allocation9], 4294965248 }
  0x23   :  { %1973 = dma.done.wait [#allocation12], 1040  }
  0x24   :  { %1974 = vsyncadd [#allocation12], 4294966256 }
  0x25   :  { %1975 = dma.done.wait [#allocation15], 4096  }
  0x26   :  { %1976 = vsyncadd [#allocation15], 4294963200  ;;  %v1642_v0 = vld [vmem:[#allocation5 + $0x38] sm:$0xff]  ;;  %v1641_v4 = vld [vmem:[#allocation5 + $0x30] sm:$0xff]  ;;  %vm1158_vm0 = vcmask 1040384   ;;  %vm1162_vm1 = vcmask 1042434  }
  0x27   :  { %v1650_v1 = vld [vmem:[#allocation5 + $0x78] sm:$0xff]  ;;  %479 = vmatpush.bf16.msra.mxu0 %v1642_v0  ;;  %v1649_v5 = vld [vmem:[#allocation5 + $0x70] sm:$0xff]  ;;  %v1640_v8 = vld [vmem:[#allocation5 + $0x28] sm:$0xff]  ;;  %vm1168_vm2 = vcmask 1041409   ;;  %vm1170_vm3 = vcmask 1043459   ;;  %vm1177_vm4 = vcmask 1044484  }
  0x28   :  { %v1658_v2 = vld [vmem:[#allocation5 + $0xb8] sm:$0xff]  ;;  %493 = vmatpush.bf16.msra.mxu1 %v1650_v1  ;;  %v1657_v6 = vld [vmem:[#allocation5 + $0xb0] sm:$0xff]  ;;  %v1648_v9 = vld [vmem:[#allocation5 + $0x68] sm:$0xff]  ;;  %vm1184_vm5 = vcmask 1045509   ;;  %vm1166_vm6 = vcmask 1041408   ;;  %vm1172_vm7 = vcmask 1042433  }
  0x29   :  { %v1666_v3 = vld [vmem:[#allocation5 + $0xf8] sm:$0xff]  ;;  %507 = vmatpush.bf16.msra.mxu2 %v1658_v2  ;;  %v1665_v7 = vld [vmem:[#allocation5 + $0xf0] sm:$0xff]  ;;  %v1656_v10 = vld [vmem:[#allocation5 + $0xa8] sm:$0xff]  ;;  %vm1179_vm8 = vcmask 1043458   ;;  %vm1186_vm9 = vcmask 1044483  }
  0x2a   :  { %521 = vmatpush.bf16.msra.mxu3 %v1666_v3  ;;  %v1664_v11 = vld [vmem:[#allocation5 + $0xe8] sm:$0xff]  ;;  %v1639_v12 = vld [vmem:[#allocation5 + $0x20] sm:$0xff]  ;;  %v170_v18 = vld [vmem:[#allocation2 + $0x10] sm:$0xff] }
  0x2b   :  { %480 = vmatpush.bf16.msra.mxu0 %v1641_v4  ;;  %v1647_v13 = vld [vmem:[#allocation5 + $0x60] sm:$0xff]  ;;  %v169_v17 = vld [vmem:[#allocation2 + $0x8] sm:$0xff]  ;;  %v171_v19 = vld [vmem:[#allocation2 + $0x18] sm:$0xff]  ;;  %188 = vst [vmem:[#allocation1 + $0x2] ss:$4 sm:$0xff] %v170_v18 }
  0x2c   :  { %494 = vmatpush.bf16.msra.mxu1 %v1649_v5  ;;  %v1655_v14 = vld [vmem:[#allocation5 + $0xa0] sm:$0xff]  ;;  %v1638_v20 = vld [vmem:[#allocation5 + $0x18] sm:$0xff]  ;;  %186 = vst [vmem:[#allocation1 + $0x1] ss:$4 sm:$0xff] %v169_v17  ;;  %v173_v25 = vld [vmem:[#allocation2 + $0x28] sm:$0xff] }
  0x2d   :  { %508 = vmatpush.bf16.msra.mxu2 %v1657_v6  ;;  %v1663_v15 = vld [vmem:[#allocation5 + $0xe0] sm:$0xff]  ;;  %v1646_v21 = vld [vmem:[#allocation5 + $0x58] sm:$0xff]  ;;  %v174_v26 = vld [vmem:[#allocation2 + $0x30] sm:$0xff]  ;;  %190 = vst [vmem:[#allocation1 + $0x3] ss:$4 sm:$0xff] %v171_v19 }
  0x2e   :  { %522 = vmatpush.bf16.msra.mxu3 %v1665_v7  ;;  %v168_v16 = vld [vmem:[#allocation2] sm:$0xff]  ;;  %v1654_v23 = vld [vmem:[#allocation5 + $0x98] sm:$0xff]  ;;  %194 = vst [vmem:[#allocation1 + $0x21] ss:$4 sm:$0xff] %v173_v25  ;;  %v1637_v28 = vld [vmem:[#allocation5 + $0x10] sm:$0xff] }
  0x2f   :  { %481 = vmatpush.bf16.msra.mxu0 %v1640_v8  ;;  %184 = vst [vmem:[#allocation1] ss:$4 sm:$0xff] %v168_v16  ;;  %v172_v22 = vld [vmem:[#allocation2 + $0x20] sm:$0xff]  ;;  %v1662_v24 = vld [vmem:[#allocation5 + $0xd8] sm:$0xff]  ;;  %v1645_v29 = vld [vmem:[#allocation5 + $0x50] sm:$0xff] }
  0x30   :  { %495 = vmatpush.bf16.msra.mxu1 %v1648_v9  ;;  %v175_v27 = vld [vmem:[#allocation2 + $0x38] sm:$0xff]  ;;  %192 = vst [vmem:[#allocation1 + $0x20] ss:$4 sm:$0xff] %v172_v22  ;;  %v1653_v30 = vld [vmem:[#allocation5 + $0x90] sm:$0xff]  ;;  %v1636_v32 = vld [vmem:[#allocation5 + $0x8] sm:$0xff] }
  0x31   :  { %509 = vmatpush.bf16.msra.mxu2 %v1656_v10  ;;  %196 = vst [vmem:[#allocation1 + $0x22] ss:$4 sm:$0xff] %v174_v26  ;;  %v1661_v31 = vld [vmem:[#allocation5 + $0xd0] sm:$0xff]  ;;  %v1644_v33 = vld [vmem:[#allocation5 + $0x48] sm:$0xff]  ;;  %v1635_v36 = vld [vmem:[#allocation5] sm:$0xff] }
  0x32   :  { %523 = vmatpush.bf16.msra.mxu3 %v1664_v11  ;;  %198 = vst [vmem:[#allocation1 + $0x23] ss:$4 sm:$0xff] %v175_v27  ;;  %v1652_v34 = vld [vmem:[#allocation5 + $0x88] sm:$0xff]  ;;  %v1643_v37 = vld [vmem:[#allocation5 + $0x40] sm:$0xff]  ;;  %v1674_v48 = vld [vmem:[#allocation7 + $0x38] sm:$0xff] }
  0x33   :  { %482 = vmatpush.bf16.msra.mxu0 %v1639_v12  ;;  %v1660_v35 = vld [vmem:[#allocation5 + $0xc8] sm:$0xff]  ;;  %v1651_v40 = vld [vmem:[#allocation5 + $0x80] sm:$0xff]  ;;  %v1673_v53 = vld [vmem:[#allocation7 + $0x30] sm:$0xff] }
  0x34   :  { %496 = vmatpush.bf16.msra.mxu1 %v1647_v13  ;;  %v1659_v41 = vld [vmem:[#allocation5 + $0xc0] sm:$0xff]  ;;  %v1672_v54 = vld [vmem:[#allocation7 + $0x28] sm:$0xff]  ;;  %v1670_v56 = vld [vmem:[#allocation7 + $0x18] sm:$0xff] }
  0x35   :  { %510 = vmatpush.bf16.msra.mxu2 %v1655_v14  ;;  %v1671_v55 = vld [vmem:[#allocation7 + $0x20] sm:$0xff]  ;;  %v1669_v57 = vld [vmem:[#allocation7 + $0x10] sm:$0xff]  ;;  %v1668_v58 = vld [vmem:[#allocation7 + $0x8] sm:$0xff] }
  0x36   :  { %524 = vmatpush.bf16.msra.mxu3 %v1663_v15  ;;  %v199_v38 = vld.sshfl [vmem:[#allocation1] sm:$0xff pattern:$0x73625140]  ;;  %v200_v39 = vld.sshfl [vmem:[#allocation1 + $0x8] sm:$0xff pattern:$0x73625140] }
  0x37   :  { %483 = vmatpush.bf16.msra.mxu0 %v1638_v20  ;;  %v201_v42 = vld.sshfl [vmem:[#allocation1 + $0x10] sm:$0xff pattern:$0x73625140]  ;;  %v202_v43 = vld.sshfl [vmem:[#allocation1 + $0x18] sm:$0xff pattern:$0x73625140] }
  0x38   :  { %497 = vmatpush.bf16.msra.mxu1 %v1646_v21  ;;  %v1667_v59 = vld [vmem:[#allocation7] sm:$0xff]  ;;  %v1682_v60 = vld [vmem:[#allocation8 + $0x38] sm:$0xff]  ;;  %v1681_v61 = vld [vmem:[#allocation8 + $0x30] sm:$0xff] }
  0x39   :  { %511 = vmatpush.bf16.msra.mxu2 %v1654_v23  ;;  %v203_v44 = vld.sshfl [vmem:[#allocation1 + $0x20] sm:$0xff pattern:$0x73625140]  ;;  %v204_v45 = vld.sshfl [vmem:[#allocation1 + $0x28] sm:$0xff pattern:$0x73625140] }
  0x3a   :  { %525 = vmatpush.bf16.msra.mxu3 %v1662_v24  ;;  %v205_v46 = vld.sshfl [vmem:[#allocation1 + $0x30] sm:$0xff pattern:$0x73625140]  ;;  %v206_v47 = vld.sshfl [vmem:[#allocation1 + $0x38] sm:$0xff pattern:$0x73625140]  ;;  %v215_v49 = vpack.c.bf16 %v203_v44, %v199_v38  ;;  %v216_v50 = vpack.c.bf16 %v204_v45, %v200_v39 }
  0x3b   :  { %484 = vmatpush.bf16.msra.mxu0 %v1637_v28  ;;  %v217_v51 = vpack.c.bf16 %v205_v46, %v201_v42  ;;  %v218_v52 = vpack.c.bf16 %v206_v47, %v202_v43  ;;  %v1680_v62 = vld [vmem:[#allocation8 + $0x28] sm:$0xff]  ;;  %v1746_v63 = vld [vmem:[%s2150_s2] ss:$0 sm:$0xff]  ;;  %v1679_v1 = vld [vmem:[#allocation8 + $0x20] sm:$0xff] }
  0x3c   :  { %498 = vmatpush.bf16.msra.mxu1 %v1645_v29  ;;  %v1678_v20 = vld [vmem:[#allocation8 + $0x18] sm:$0xff]  ;;  %v1677_v21 = vld [vmem:[#allocation8 + $0x10] sm:$0xff]  ;;  %v1676_v22 = vld [vmem:[#allocation8 + $0x8] sm:$0xff] }
  0x3d   :  { %512 = vmatpush.bf16.msra.mxu2 %v1653_v30  ;;  %v1675_v23 = vld [vmem:[#allocation8] sm:$0xff]  ;;  %v1690_v24 = vld [vmem:[#allocation10 + $0x38] sm:$0xff]  ;;  %v1689_v25 = vld [vmem:[#allocation10 + $0x30] sm:$0xff] }
  0x3e   :  { %526 = vmatpush.bf16.msra.mxu3 %v1661_v31  ;;  %v1688_v26 = vld [vmem:[#allocation10 + $0x28] sm:$0xff]  ;;  %v1687_v27 = vld [vmem:[#allocation10 + $0x20] sm:$0xff]  ;;  %v1747_v29 = vld [vmem:[%s2152_s4] ss:$0 sm:$0xff] }
  0x3f   :  { %485 = vmatpush.bf16.msra.mxu0 %v1636_v32  ;;  %v1684_v38 = vld [vmem:[#allocation10 + $0x8] sm:$0xff]  ;;  %v1683_v39 = vld [vmem:[#allocation10] sm:$0xff]  ;;  %v1748_v45 = vld [vmem:[%s2154_s6] ss:$0 sm:$0xff] }
  0x40   :  { %499 = vmatpush.bf16.msra.mxu1 %v1644_v33  ;;  %v1696_v42 = vld [vmem:[#allocation13 + $0x28] sm:$0xff]  ;;  %v1695_v43 = vld [vmem:[#allocation13 + $0x20] sm:$0xff] }
  0x41   :  { %513 = vmatpush.bf16.msra.mxu2 %v1652_v34 }
  0x42   :  { %527 = vmatpush.bf16.msra.mxu3 %v1660_v35 }
  0x43   :  { %486 = vmatpush.bf16.msra.mxu0 %v1635_v36  ;;  %v1686_v36 = vld [vmem:[#allocation10 + $0x18] sm:$0xff] }
  0x44   :  { %500 = vmatpush.bf16.msra.mxu1 %v1643_v37  ;;  %v1685_v37 = vld [vmem:[#allocation10 + $0x10] sm:$0xff] }
  0x45   :  { %514 = vmatpush.bf16.msra.mxu2 %v1651_v40  ;;  %v1698_v40 = vld [vmem:[#allocation13 + $0x38] sm:$0xff] }
  0x46   :  { %528 = vmatpush.bf16.msra.mxu3 %v1659_v41  ;;  %487 = vmatmul.bf16.vlgmr.msra.gmra.mxu0 %v215_v49  ;;  %v1697_v41 = vld [vmem:[#allocation13 + $0x30] sm:$0xff] }
  0x47   :  { %606 = vmatpush.bf16.msrb.mxu0 %v1674_v48  ;;  %501 = vmatmul.bf16.vlgmr.msra.gmra.mxu1 %v216_v50 }
  0x48   :  { %515 = vmatmul.bf16.vlgmr.msra.gmra.mxu2 %v217_v51  ;;  %691 = vmatpush.bf16.msrb.mxu1 %v1682_v60  ;;  %v1623_v60 = vld [vmem:[#allocation14 + $0xf0] sm:$0xf0] }
  0x49   :  { %529 = vmatmul.bf16.vlgmr.msra.gmra.mxu3 %v218_v52  ;;  %776 = vmatpush.bf16.msrb.mxu2 %v1690_v24  ;;  %v1694_v52 = vld [vmem:[#allocation13 + $0x18] sm:$0xff] }
  0x4a   :  { %861 = vmatpush.bf16.msrb.mxu3 %v1698_v40  ;;  %v1599_v24 = vld [vmem:[#allocation14 + $0xb8] sm:$0xf0] }
  0x4b   :  { %607 = vmatpush.bf16.msrb.mxu0 %v1673_v53  ;;  %v1693_v53 = vld [vmem:[#allocation13 + $0x10] sm:$0xff] }
  0x4c   :  { %692 = vmatpush.bf16.msrb.mxu1 %v1681_v61  ;;  %v1629_v61 = vld [vmem:[#allocation14 + $0xe8] sm:$0xf] }
  0x4d   :  { %777 = vmatpush.bf16.msrb.mxu2 %v1689_v25 }
  0x4e   :  { %862 = vmatpush.bf16.msrb.mxu3 %v1697_v41  ;;  %v1749_v41 = vld [vmem:[#allocation11] ss:$0 sm:$0xff] }
  0x4f   :  { %608 = vmatpush.bf16.msrb.mxu0 %v1672_v54  ;;  %v1692_v54 = vld [vmem:[#allocation13 + $0x8] sm:$0xff] }
  0x50   :  { %693 = vmatpush.bf16.msrb.mxu1 %v1680_v62  ;;  %v1730_v62 = vld [vmem:[#allocation14 + $0xf4] sm:$0xf0] }
  0x51   :  { %778 = vmatpush.bf16.msrb.mxu2 %v1688_v26 }
  0x52   :  { %863 = vmatpush.bf16.msrb.mxu3 %v1696_v42 }
  0x53   :  { %609 = vmatpush.bf16.msrb.mxu0 %v1671_v55  ;;  %v1691_v55 = vld [vmem:[#allocation13] sm:$0xff] }
  0x54   :  { %694 = vmatpush.bf16.msrb.mxu1 %v1679_v1  ;;  %v1728_v1 = vld [vmem:[#allocation14 + $0xec] sm:$0xf] }
  0x55   :  { %779 = vmatpush.bf16.msrb.mxu2 %v1687_v27  ;;  %v1573_v27 = vld [vmem:[#allocation14 + $0x80] sm:$0xf] }
  0x56   :  { %864 = vmatpush.bf16.msrb.mxu3 %v1695_v43 }
  0x57   :  { %610 = vmatpush.bf16.msrb.mxu0 %v1670_v56  ;;  %v1621_v56 = vld [vmem:[#allocation14 + $0xe0] sm:$0xf] }
  0x58   :  { %695 = vmatpush.bf16.msrb.mxu1 %v1678_v20  ;;  %v1597_v20 = vld [vmem:[#allocation14 + $0xa8] sm:$0xf] }
  0x59   :  { %780 = vmatpush.bf16.msrb.mxu2 %v1686_v36 }
  0x5a   :  { %865 = vmatpush.bf16.msrb.mxu3 %v1694_v52  ;;  %v1559_v52 = vld [vmem:[#allocation14 + $0x70] sm:$0xf0] }
  0x5b   :  { %611 = vmatpush.bf16.msrb.mxu0 %v1669_v57  ;;  %v1729_v57 = vld [vmem:[#allocation14 + $0xec] sm:$0xf0] }
  0x5c   :  { %696 = vmatpush.bf16.msrb.mxu1 %v1677_v21 }
  0x5d   :  { %781 = vmatpush.bf16.msrb.mxu2 %v1685_v37 }
  0x5e   :  { %866 = vmatpush.bf16.msrb.mxu3 %v1693_v53  ;;  %v1565_v53 = vld [vmem:[#allocation14 + $0x68] sm:$0xf] }
  0x5f   :  { %612 = vmatpush.bf16.msrb.mxu0 %v1668_v58  ;;  %v1727_v58 = vld [vmem:[#allocation14 + $0xe4] sm:$0xf] }
  0x60   :  { %697 = vmatpush.bf16.msrb.mxu1 %v1676_v22  ;;  %v1722_v22 = vld [vmem:[#allocation14 + $0xb4] sm:$0xf0] }
  0x61   :  { %782 = vmatpush.bf16.msrb.mxu2 %v1684_v38  ;;  %v1598_v26 = vor.u32 %v1722_v22, %v1597_v20  ;;  %v1509_v20 = vld [vmem:[#allocation14] sm:$0xf]  ;;  %v1699_v22 = vld [vmem:[#allocation14 + $0x4] sm:$0xf] }
  0x62   :  { %867 = vmatpush.bf16.msrb.mxu3 %v1692_v54  ;;  %v1714_v54 = vld [vmem:[#allocation14 + $0x74] sm:$0xf0] }
  0x63   :  { %613 = vmatpush.bf16.msrb.mxu0 %v1667_v59  ;;  %v1622_v59 = vor.u32 %v1729_v57, %v1621_v56  ;;  %v1566_v56 = vor.u32 %v1714_v54, %v1565_v53  ;;  %v1712_v57 = vld [vmem:[#allocation14 + $0x6c] sm:$0xf] }
  0x64   :  { %698 = vmatpush.bf16.msrb.mxu1 %v1675_v23  ;;  %v1720_v23 = vld [vmem:[#allocation14 + $0xac] sm:$0xf] }
  0x65   :  { %783 = vmatpush.bf16.msrb.mxu2 %v1683_v39 }
  0x66   :  { %868 = vmatpush.bf16.msrb.mxu3 %v1691_v55 }
  0x67   :  { %1080 = vmatpush.bf16.msra.mxu0 %v1622_v59 }
  0xc3   :  { %v488_v0 = vpop.f32.mrf.mxu0 }
  0xc4   :  { %v502_v2 = vpop.f32.mrf.mxu1  ;;  %v489_v3 = vadd.f32 %v1746_v63, %v488_v0  ;;  %v1630_v0 = vor.u32 %v1730_v62, %v1629_v61  ;;  %v1709_v61 = vld [vmem:[#allocation14 + $0x4c] sm:$0xf0]  ;;  %v1707_v62 = vld [vmem:[#allocation14 + $0x44] sm:$0xf] }
  0xc6   :  { %v503_v6 = vadd.f32 %v502_v2, %v489_v3  ;;  %v1631_v2 = vld [vmem:[#allocation14 + $0xf8] sm:$0xf0]  ;;  %v1605_v3 = vld [vmem:[#allocation14 + $0xc0] sm:$0xf]  ;;  %1108 = vmatpush.bf16.msra.mxu2 %v1630_v0  ;;  %v1543_v0 = vld [vmem:[#allocation14 + $0x50] sm:$0xf0] }
  0xcb   :  { %v516_v4 = vpop.f32.mrf.mxu2  ;;  %v490_v7 = vpop.f32.mrf.mxu0 }
  0xcc   :  { %v530_v5 = vpop.f32.mrf.mxu3  ;;  %v491_v8 = vadd.f32 %v1746_v63, %v490_v7  ;;  %v517_v9 = vadd.f32 %v516_v4, %v503_v6  ;;  %v504_v10 = vpop.f32.mrf.mxu1  ;;  %v1626_v63 = vor.u32 %v1727_v58, %v1623_v60  ;;  %v1634_v4 = vor.u32 %v1728_v1, %v1631_v2  ;;  %v1723_v6 = vld [vmem:[#allocation14 + $0xc4] sm:$0xf]  ;;  %v1607_v7 = vld [vmem:[#allocation14 + $0xd0] sm:$0xf0]  ;;  %v1567_v58 = vld [vmem:[#allocation14 + $0x78] sm:$0xf0] }
  0xcd   :  { %v1570_v59 = vor.u32 %v1712_v57, %v1567_v58  ;;  %v1541_v60 = vld [vmem:[#allocation14 + $0x40] sm:$0xf]  ;;  %v1549_v1 = vld [vmem:[#allocation14 + $0x48] sm:$0xf]  ;;  %v1710_v2 = vld [vmem:[#allocation14 + $0x54] sm:$0xf0] }
  0xce   :  { %v505_v11 = vadd.f32 %v504_v10, %v491_v8  ;;  %v531_v13 = vadd.f32 %v530_v5, %v517_v9  ;;  %v1725_v5 = vld [vmem:[#allocation14 + $0xcc] sm:$0xf0]  ;;  %1094 = vmatpush.bf16.msra.mxu1 %v1626_v63  ;;  %v1610_v9 = vor.u32 %v1723_v6, %v1607_v7  ;;  %v1613_v10 = vld [vmem:[#allocation14 + $0xc8] sm:$0xf]  ;;  %1122 = vmatpush.bf16.msra.mxu3 %v1634_v4  ;;  %v1551_v6 = vld [vmem:[#allocation14 + $0x58] sm:$0xf0] }
  0xcf   :  { %v1606_v8 = vor.u32 %v1725_v5, %v1605_v3  ;;  %v1542_v63 = vor.u32 %v1709_v61, %v1541_v60  ;;  %v1546_v3 = vor.u32 %v1707_v62, %v1543_v0  ;;  %v1550_v4 = vor.u32 %v1710_v2, %v1549_v1  ;;  %v1708_v5 = vld [vmem:[#allocation14 + $0x4c] sm:$0xf] }
  0xd0   :  { %v535_v17 = vmax.f32 %v531_v13, 0.0  ;;  %v1554_v7 = vor.u32 %v1708_v5, %v1551_v6 }
  0xd1   :  { %1081 = vmatpush.bf16.msra.mxu0 %v1606_v8  ;;  %v1525_v8 = vld [vmem:[#allocation14 + $0x20] sm:$0xf] }
  0xd2   :  { %1095 = vmatpush.bf16.msra.mxu1 %v1610_v9  ;;  %v1705_v9 = vld [vmem:[#allocation14 + $0x2c] sm:$0xf0] }
  0xd3   :  { %v518_v12 = vpop.f32.mrf.mxu2 }
  0xd4   :  { %v519_v14 = vadd.f32 %v518_v12, %v505_v11  ;;  %v532_v15 = vpop.f32.mrf.mxu3  ;;  %v1726_v11 = vld [vmem:[#allocation14 + $0xd4] sm:$0xf0]  ;;  %v1724_v12 = vld [vmem:[#allocation14 + $0xcc] sm:$0xf] }
  0xd5   :  { %v1614_v13 = vor.u32 %v1726_v11, %v1613_v10  ;;  %v1703_v10 = vld [vmem:[#allocation14 + $0x24] sm:$0xf]  ;;  %v1526_v11 = vor.u32 %v1705_v9, %v1525_v8 }
  0xd6   :  { %v533_v16 = vadd.f32 %v532_v15, %v519_v14  ;;  %v1615_v14 = vld [vmem:[#allocation14 + $0xd8] sm:$0xf0]  ;;  %v1589_v15 = vld [vmem:[#allocation14 + $0xa0] sm:$0xf] }
  0xd7   :  { %1109 = vmatpush.bf16.msra.mxu2 %v1614_v13  ;;  %v1533_v13 = vld [vmem:[#allocation14 + $0x28] sm:$0xf] }
  0xd8   :  { %v536_v18 = vmax.f32 %v533_v16, 0.0  ;;  %v1721_v16 = vld [vmem:[#allocation14 + $0xac] sm:$0xf0] }
  0xd9   :  { %v1590_v21 = vor.u32 %v1721_v16, %v1589_v15 }
  0xda   :  { %v537_v19 = vpack.c.bf16 %v536_v18, %v535_v17  ;;  %v1618_v17 = vor.u32 %v1724_v12, %v1615_v14  ;;  %v1719_v18 = vld [vmem:[#allocation14 + $0xa4] sm:$0xf]  ;;  %v1527_v12 = vld [vmem:[#allocation14 + $0x30] sm:$0xf0]  ;;  %v1706_v14 = vld [vmem:[#allocation14 + $0x34] sm:$0xf0] }
  0xdb   :  { %1082 = vmatpush.bf16.msra.mxu0 %v1590_v21  ;;  %1110 = vmatpush.bf16.msra.mxu2 %v1598_v26  ;;  %v1530_v15 = vor.u32 %v1703_v10, %v1527_v12  ;;  %v1534_v16 = vor.u32 %v1706_v14, %v1533_v13  ;;  %v1701_v21 = vld [vmem:[#allocation14 + $0xc] sm:$0xf0]  ;;  %v1702_v26 = vld [vmem:[#allocation14 + $0x14] sm:$0xf0] }
  0xdc   :  { %614 = vmatmul.bf16.vlgmr.msrb.gmra.mxu0 %v537_v19  ;;  %v1591_v19 = vld [vmem:[#allocation14 + $0xb0] sm:$0xf0]  ;;  %1123 = vmatpush.bf16.msra.mxu3 %v1618_v17  ;;  %v1704_v17 = vld [vmem:[#allocation14 + $0x2c] sm:$0xf] }
  0xdd   :  { %v1594_v25 = vor.u32 %v1719_v18, %v1591_v19  ;;  %v1535_v18 = vld [vmem:[#allocation14 + $0x38] sm:$0xf0] }
  0xde   :  { %v1538_v19 = vor.u32 %v1704_v17, %v1535_v18 }
  0xdf   :  { %1096 = vmatpush.bf16.msra.mxu1 %v1594_v25  ;;  %v1517_v25 = vld [vmem:[#allocation14 + $0x8] sm:$0xf] }
 0x159   :  { %v615_v28 = vpop.f32.mrf.mxu0 }
 0x15a   :  { %v616_v30 = vadd.f32 %v1747_v29, %v615_v28  ;;  %v1717_v28 = vld [vmem:[#allocation14 + $0x8c] sm:$0xf0] }
 0x15b   :  { %v1574_v36 = vor.u32 %v1717_v28, %v1573_v27  ;;  %v1518_v28 = vor.u32 %v1702_v26, %v1517_v25 }
 0x15c   :  { %v620_v33 = vmax.f32 %v616_v30, 0.0  ;;  %v1602_v30 = vor.u32 %v1720_v23, %v1599_v24  ;;  %v1510_v23 = vor.u32 %v1701_v21, %v1509_v20  ;;  %v1511_v24 = vld [vmem:[#allocation14 + $0x10] sm:$0xf0] }
 0x15d   :  { %1083 = vmatpush.bf16.msra.mxu0 %v1574_v36  ;;  %v1514_v27 = vor.u32 %v1699_v22, %v1511_v24 }
 0x15e   :  { %1124 = vmatpush.bf16.msra.mxu3 %v1602_v30  ;;  %v1519_v30 = vld [vmem:[#allocation14 + $0x18] sm:$0xf0] }
 0x161   :  { %v617_v31 = vpop.f32.mrf.mxu0 }
 0x162   :  { %v618_v32 = vadd.f32 %v1747_v29, %v617_v31  ;;  %v1715_v29 = vld [vmem:[#allocation14 + $0x84] sm:$0xf]  ;;  %v1575_v31 = vld [vmem:[#allocation14 + $0x90] sm:$0xf0] }
 0x163   :  { %v1578_v37 = vor.u32 %v1715_v29, %v1575_v31  ;;  %v1700_v29 = vld [vmem:[#allocation14 + $0xc] sm:$0xf] }
 0x164   :  { %v621_v34 = vmax.f32 %v618_v32, 0.0  ;;  %v1581_v32 = vld [vmem:[#allocation14 + $0x88] sm:$0xf]  ;;  %v1522_v31 = vor.u32 %v1700_v29, %v1519_v30 }
 0x165   :  { %1097 = vmatpush.bf16.msra.mxu1 %v1578_v37 }
 0x166   :  { %v622_v35 = vpack.c.bf16 %v621_v34, %v620_v33  ;;  %v1718_v33 = vld [vmem:[#allocation14 + $0x94] sm:$0xf0]  ;;  %v1716_v34 = vld [vmem:[#allocation14 + $0x8c] sm:$0xf] }
 0x167   :  { %v1582_v38 = vor.u32 %v1718_v33, %v1581_v32  ;;  %v1750_v33 = vld [vmem:[%s2158_s10] ss:$0 sm:$0xff] }
 0x168   :  { %699 = vmatmul.bf16.vlgmr.msrb.gmra.mxu1 %v622_v35  ;;  %v1583_v35 = vld [vmem:[#allocation14 + $0x98] sm:$0xf0] }
 0x169   :  { %v1586_v39 = vor.u32 %v1716_v34, %v1583_v35  ;;  %1111 = vmatpush.bf16.msra.mxu2 %v1582_v38 }
 0x16b   :  { %1125 = vmatpush.bf16.msra.mxu3 %v1586_v39 }
 0x16d   :  { %1112 = vmatpush.bf16.msra.mxu2 %v1566_v56 }
 0x16f   :  { %1126 = vmatpush.bf16.msra.mxu3 %v1570_v59 }
 0x171   :  { %1113 = vmatpush.bf16.msra.mxu2 %v1550_v4 }
 0x173   :  { %1127 = vmatpush.bf16.msra.mxu3 %v1554_v7 }
 0x175   :  { %1114 = vmatpush.bf16.msra.mxu2 %v1534_v16 }
 0x177   :  { %1128 = vmatpush.bf16.msra.mxu3 %v1538_v19 }
 0x179   :  { %1115 = vmatpush.bf16.msra.mxu2 %v1518_v28 }
 0x17b   :  { %1129 = vmatpush.bf16.msra.mxu3 %v1522_v31 }
 0x1e5   :  { %v700_v44 = vpop.f32.mrf.mxu1 }
 0x1e6   :  { %v701_v46 = vadd.f32 %v1748_v45, %v700_v44 }
 0x1e8   :  { %v705_v49 = vmax.f32 %v701_v46, 0.0 }
 0x1ed   :  { %v702_v47 = vpop.f32.mrf.mxu1 }
 0x1ee   :  { %v703_v48 = vadd.f32 %v1748_v45, %v702_v47 }
 0x1f0   :  { %v706_v50 = vmax.f32 %v703_v48, 0.0  ;;  %v1557_v48 = vld [vmem:[#allocation14 + $0x60] sm:$0xf] }
 0x1f2   :  { %v707_v51 = vpack.c.bf16 %v706_v50, %v705_v49  ;;  %v1713_v49 = vld [vmem:[#allocation14 + $0x6c] sm:$0xf0]  ;;  %v1711_v50 = vld [vmem:[#allocation14 + $0x64] sm:$0xf] }
 0x1f3   :  { %v1562_v55 = vor.u32 %v1711_v50, %v1559_v52 }
 0x1f4   :  { %784 = vmatmul.bf16.vlgmr.msrb.gmra.mxu2 %v707_v51  ;;  %v1558_v51 = vor.u32 %v1713_v49, %v1557_v48 }
 0x1f5   :  { %1098 = vmatpush.bf16.msra.mxu1 %v1562_v55 }
 0x1f6   :  { %1084 = vmatpush.bf16.msra.mxu0 %v1558_v51 }
 0x1f9   :  { %1099 = vmatpush.bf16.msra.mxu1 %v1546_v3 }
 0x1fa   :  { %1085 = vmatpush.bf16.msra.mxu0 %v1542_v63 }
 0x1fd   :  { %1100 = vmatpush.bf16.msra.mxu1 %v1530_v15 }
 0x1fe   :  { %1086 = vmatpush.bf16.msra.mxu0 %v1526_v11 }
 0x201   :  { %1101 = vmatpush.bf16.msra.mxu1 %v1514_v27 }
 0x202   :  { %1087 = vmatpush.bf16.msra.mxu0 %v1510_v23 }
 0x277   :  { %v785_v40 = vpop.f32.mrf.mxu2 }
 0x278   :  { %v786_v42 = vadd.f32 %v1749_v41, %v785_v40  ;;  %v910_v40 = vld [vmem:[%s2160_s12] sm:$0xf] }
 0x279   :  { %v914_v49 = vperm.slane %v910_v40, 2  ;;  %v915_v50 = vperm.slane %v910_v40, 3 }
 0x27a   :  { %v790_v45 = vmax.f32 %v786_v42, 0.0  ;;  %v913_v42 = vperm.slane %v910_v40, 1 }
 0x27f   :  { %v787_v43 = vpop.f32.mrf.mxu2 }
 0x280   :  { %v788_v44 = vadd.f32 %v1749_v41, %v787_v43  ;;  %v912_v41 = vperm.slane %v910_v40, 0 }
 0x282   :  { %v791_v46 = vmax.f32 %v788_v44, 0.0 }
 0x284   :  { %v792_v47 = vpack.c.bf16 %v791_v46, %v790_v45 }
 0x286   :  { %869 = vmatmul.bf16.vlgmr.msrb.gmra.mxu3 %v792_v47 }
 0x309   :  { %v870_v32 = vpop.f32.mrf.mxu3 }
 0x30a   :  { %v871_v34 = vadd.f32 %v1750_v33, %v870_v32 }
 0x30c   :  { %v875_v37 = vmax.f32 %v871_v34, 0.0 }
 0x311   :  { %v872_v35 = vpop.f32.mrf.mxu3 }
 0x312   :  { %v873_v36 = vadd.f32 %v1750_v33, %v872_v35 }
 0x314   :  { %v876_v38 = vmax.f32 %v873_v36, 0.0 }
 0x316   :  { %v877_v39 = vpack.c.bf16 %v876_v38, %v875_v37 }
 0x318   :  { %1088 = vmatmul.bf16.vlgmr.msra.gmra.mxu0 %v877_v39  ;;  %1102 = vmatmul.bf16.vlgmr.msra.gmra.mxu1 %v877_v39 }
 0x319   :  { %1116 = vmatmul.bf16.vlgmr.msra.gmra.mxu2 %v877_v39  ;;  %1130 = vmatmul.bf16.vlgmr.msra.gmra.mxu3 %v877_v39 }
 0x395   :  { %v1089_v43 = vpop.f32.mrf.mxu0  ;;  %v1103_v44 = vpop.f32.mrf.mxu1 }
 0x396   :  { %v1090_v45 = vadd.f32 %v1089_v43, %v912_v41  ;;  %v1104_v46 = vadd.f32 %v1103_v44, %v913_v42 }
 0x398   :  { %v1136_v47 = vmax.f32 %v1090_v45, 0.0  ;;  %v1137_v48 = vmax.f32 %v1104_v46, 0.0 }
 0x39a   :  { %v1144_v51 = vpack.c.bf16 %v1137_v48, %v1136_v47 }
 0x39c   :  { %v1117_v52 = vpop.f32.mrf.mxu2  ;;  %v1131_v53 = vpop.f32.mrf.mxu3  ;;  %v1152_v62 = vrot.slane %v1144_v51, 3 }
 0x39d   :  { %v1118_v54 = vadd.f32 %v1117_v52, %v914_v49  ;;  %v1132_v55 = vadd.f32 %v1131_v53, %v915_v50  ;;  %v1091_v56 = vpop.f32.mrf.mxu0  ;;  %v1105_v57 = vpop.f32.mrf.mxu1 }
 0x39e   :  { %v1092_v60 = vadd.f32 %v1091_v56, %v912_v41  ;;  %v1106_v61 = vadd.f32 %v1105_v57, %v913_v42  ;;  %v1161_v4 = vsel %vm1158_vm0, %v1144_v51, %v1152_v62  ;;  %v1169_v5 = vsel %vm1168_vm2, %v1144_v51, %v1152_v62 }
 0x39f   :  { %v1138_v58 = vmax.f32 %v1118_v54, 0.0  ;;  %v1139_v59 = vmax.f32 %v1132_v55, 0.0  ;;  %v1176_v6 = vsel %vm1162_vm1, %v1144_v51, %v1152_v62  ;;  %v1183_v7 = vsel %vm1170_vm3, %v1144_v51, %v1152_v62 }
 0x3a0   :  { %v1140_v2 = vmax.f32 %v1092_v60, 0.0  ;;  %v1141_v3 = vmax.f32 %v1106_v61, 0.0 }
 0x3a1   :  { %v1145_v63 = vpack.c.bf16 %v1139_v59, %v1138_v58 }
 0x3a2   :  { %v1146_v21 = vpack.c.bf16 %v1141_v3, %v1140_v2 }
 0x3a3   :  { %v1153_v0 = vrot.slane %v1145_v63, 6  ;;  %v1154_v1 = vrot.slane %v1145_v63, 1 }
 0x3a4   :  { %v1119_v12 = vpop.f32.mrf.mxu2  ;;  %v1133_v13 = vpop.f32.mrf.mxu3  ;;  %v1155_v26 = vrot.slane %v1146_v21, 3 }
 0x3a5   :  { %v1165_v8 = vsel %vm1162_vm1, %v1153_v0, %v1154_v1  ;;  %v1171_v9 = vsel %vm1170_vm3, %v1153_v0, %v1154_v1  ;;  %v1178_v10 = vsel %vm1177_vm4, %v1153_v0, %v1154_v1  ;;  %v1185_v11 = vsel %vm1184_vm5, %v1153_v0, %v1154_v1 }
 0x3a6   :  { %v1167_v14 = vsel %vm1166_vm6, %v1161_v4, %v1165_v8  ;;  %v1173_v15 = vsel %vm1172_vm7, %v1169_v5, %v1171_v9  ;;  %v1180_v16 = vsel %vm1179_vm8, %v1176_v6, %v1178_v10  ;;  %v1187_v17 = vsel %vm1186_vm9, %v1183_v7, %v1185_v11 }
 0x3a7   :  { %v1175_v18 = vrot.slane %v1173_v15, 1  ;;  %v1182_v19 = vrot.slane %v1180_v16, 2  ;;  %v1189_v20 = vrot.slane %v1187_v17, 3  ;;  %1220 = vst [vmem:[#allocation16] sm:$0xf] %v1167_v14  ;;  %v1120_v22 = vadd.f32 %v1119_v12, %v914_v49 }
 0x3a8   :  { %v1134_v23 = vadd.f32 %v1133_v13, %v915_v50  ;;  %v1192_v30 = vsel %vm1158_vm0, %v1146_v21, %v1155_v26  ;;  %v1197_v31 = vsel %vm1168_vm2, %v1146_v21, %v1155_v26  ;;  %v1202_v32 = vsel %vm1162_vm1, %v1146_v21, %v1155_v26 }
 0x3a9   :  { %1221 = vst [vmem:[#allocation16 + $0x4] sm:$0xf] %v1175_v18  ;;  %v1142_v24 = vmax.f32 %v1120_v22, 0.0  ;;  %v1207_v33 = vsel %vm1170_vm3, %v1146_v21, %v1155_v26 }
 0x3aa   :  { %1222 = vst [vmem:[#allocation16 + $0x8] sm:$0xf] %v1182_v19  ;;  %v1143_v25 = vmax.f32 %v1134_v23, 0.0 }
 0x3ab   :  { %1223 = vst [vmem:[#allocation16 + $0xc] sm:$0xf] %v1189_v20 }
 0x3ac   :  { %v1147_v27 = vpack.c.bf16 %v1143_v25, %v1142_v24 }
 0x3ae   :  { %v1156_v28 = vrot.slane %v1147_v27, 6  ;;  %v1157_v29 = vrot.slane %v1147_v27, 1 }
 0x3b0   :  { %v1195_v34 = vsel %vm1162_vm1, %v1156_v28, %v1157_v29  ;;  %v1198_v35 = vsel %vm1170_vm3, %v1156_v28, %v1157_v29  ;;  %v1203_v36 = vsel %vm1177_vm4, %v1156_v28, %v1157_v29  ;;  %v1208_v37 = vsel %vm1184_vm5, %v1156_v28, %v1157_v29 }
 0x3b1   :  { %v1196_v38 = vsel %vm1166_vm6, %v1192_v30, %v1195_v34  ;;  %v1199_v39 = vsel %vm1172_vm7, %v1197_v31, %v1198_v35  ;;  %v1204_v40 = vsel %vm1179_vm8, %v1202_v32, %v1203_v36  ;;  %v1209_v41 = vsel %vm1186_vm9, %v1207_v33, %v1208_v37 }
 0x3b2   :  { %v1201_v42 = vrot.slane %v1199_v39, 1  ;;  %v1206_v43 = vrot.slane %v1204_v40, 2  ;;  %v1211_v44 = vrot.slane %v1209_v41, 3  ;;  %1224 = vst [vmem:[#allocation16 + $0x10] sm:$0xf] %v1196_v38 }
 0x3b4   :  { %1225 = vst [vmem:[#allocation16 + $0x14] sm:$0xf] %v1201_v42 }
 0x3b5   :  { %1226 = vst [vmem:[#allocation16 + $0x18] sm:$0xf] %v1206_v43 }
 0x3b6   :  { %1227 = vst [vmem:[#allocation16 + $0x1c] sm:$0xf] %v1211_v44 }
 0x3b7   :  { %1231 = vsyncadd [#allocation4], 448  ;;  %s1234_s19 = sshll.u32 %s2161_s13, 4  ;;  %s1993_s20 = smov [#allocation16]   ;;  %s1235_s19 = int_to_ptr.hbm [resolvable:$true] %s1234_s19 }
 0x3b8   :  { %s1232_s1 = sshll.u32 %s1993_s20, 4  ;;  %s1233_s1 = int_to_ptr.vmem [resolvable:$true] %s1232_s1 }
 0x3b9   :  { %1240 = dma.vmem_to_hbm [thread:$0]  %s1233_s1, 64, %s1235_s19, [#allocation4], %s1980_s16, %s1980_s16, %s1981_s17  }
 0x3ba   :  { %1977 = dma.done.wait [#allocation4], 512  }
 0x3bb   :  { %1978 = vsyncadd [#allocation4], 4294966784 }
 0x3bc   :  { %1245 = vsyncpa [#allocation3], 1 }
 0x3bd   :  { %1246 = vsyncpa [#allocation6], 1 }
 0x3be   :  { %1247 = vsyncpa [#allocation9], 1 }
 0x3bf   :  { %1248 = vsyncpa [#allocation12], 1 }
 0x3c0   :  { %1249 = vsyncpa [#allocation15], 1 }
 0x3c1   :  { %1250 = vsyncpa [#allocation4], 1 }

</bundles_post_ra>
